<compile_context>
chip_gen: v7x
topology: tpu7x:2x2x1
jax: 0.10.0
libtpu: 0.0.40
codegen_flags: <defaults>
</compile_context>

<pallas_src>
import functools

import jax
import jax.numpy as jnp
from jax.experimental import pallas as pl
from jax.experimental.pallas import tpu as pltpu


def _exp_activation_kernel(x_ref, o_ref, *, max_light):
    # Hot path: clamp (VPU min) + exp (EUP), whole tile at once.
    o_ref[...] = jnp.exp(jnp.minimum(x_ref[...], max_light))


def _pick_lane(n):
    """Largest lane width (multiple of 128) that evenly divides n, else None."""
    for lane in (1024, 512, 256, 128):
        if n % lane == 0:
            return lane
    return None


def exp_activation(x, max_light=5.0):
    """exp(clamp(x, max=max_light)) via a tiled Pallas TPU kernel.

    Elementwise and layout-agnostic, so results match PyTorch exactly at the
    same NCHW indices for any input shape / float dtype.
    """
    orig_shape = x.shape
    dtype = x.dtype
    itemsize = jnp.dtype(dtype).itemsize

    flat = x.reshape(-1)
    n = flat.shape[0]

    lane = _pick_lane(n)
    padded = False
    if lane is None:
        # Rare ragged case: pad only up to the next multiple of 128 lanes
        # (one small pad, sliced back at the end).
        lane = 128
        n_pad = pl.cdiv(n, lane) * lane
        flat = jnp.pad(flat, (0, n_pad - n))
        padded = True

    rows = flat.shape[0] // lane
    slab = flat.reshape(rows, lane)

    # Target ~2 MiB per block; rows-per-block a multiple of 16 (bf16-safe
    # sublane tiling) unless a single block covers the whole array.
    target_bytes = 2 * 1024 * 1024
    tile_rows = max(16, target_bytes // (lane * itemsize))
    tile_rows = (tile_rows // 16) * 16
    if tile_rows >= rows:
        tile_rows = rows  # full-extent block is always a legal block shape

    grid = (pl.cdiv(rows, tile_rows),)

    kernel = functools.partial(_exp_activation_kernel,
                               max_light=float(max_light))

    out = pl.pallas_call(
        kernel,
        out_shape=jax.ShapeDtypeStruct((rows, lane), dtype),
        grid_spec=pltpu.PrefetchScalarGridSpec(
            num_scalar_prefetch=0,
            grid=grid,
            in_specs=[pl.BlockSpec((tile_rows, lane), lambda i: (i, 0))],
            out_specs=pl.BlockSpec((tile_rows, lane), lambda i: (i, 0)),
        ),
        compiler_params=pltpu.CompilerParams(
            dimension_semantics=("parallel",),
        ),
    )(slab)

    flat_out = out.reshape(-1)
    if padded:
        flat_out = flat_out[:n]
    return flat_out.reshape(orig_shape)


if __name__ == "__main__":
    key = jax.random.PRNGKey(0)

    # NCHW input, consistent with the module's typical use on image-like tensors.
    x = jax.random.normal(key, (2, 4, 16, 16), dtype=jnp.float32) * 4.0
    y = exp_activation(x, max_light=5.0)
    y = jax.block_until_ready(y)

    y_ref = jnp.exp(jnp.minimum(x, 5.0))
    assert y.shape == x.shape and y.dtype == x.dtype
    assert jnp.allclose(y, y_ref, rtol=1e-6, atol=1e-6)

    # Ragged-size input exercises the pad-to-128 + slice fallback path.
    x2 = jax.random.normal(jax.random.PRNGKey(1), (3, 5, 7), dtype=jnp.float32) * 4.0
    y2 = jax.block_until_ready(exp_activation(x2, max_light=5.0))
    y2_ref = jnp.exp(jnp.minimum(x2, 5.0))
    assert y2.shape == x2.shape and y2.dtype == x2.dtype
    assert jnp.allclose(y2, y2_ref, rtol=1e-6, atol=1e-6)

    print("KERNEL_OK")
</pallas_src>

<mosaic_0001>
module attributes {stable_mosaic.version = 11 : i64} {
  func.func @_exp_activation_kernel(%arg0: i32, %arg1: memref<2x1024xf32, #tpu.memory_space<vmem>>, %arg2: memref<2x1024xf32, #tpu.memory_space<vmem>>) attributes {dimension_semantics = [#tpu.dimension_semantics<parallel>], iteration_bounds = array<i64: 1>, scalar_prefetch = 0 : i64, scratch_operands = 0 : i64, tpu.core_type = #tpu.core_type<tc>, window_params = [{transform_indices = @transform_0, window_bounds = array<i64: 2, 1024>}, {transform_indices = @transform_1, window_bounds = array<i64: 2, 1024>}]} {
    %c0 = arith.constant 0 : index
    %c0_0 = arith.constant 0 : index
    %0 = vector.load %arg1[%c0, %c0_0] : memref<2x1024xf32, #tpu.memory_space<vmem>>, vector<2x1024xf32>
    %cst = arith.constant 5.000000e+00 : f32
    %1 = vector.broadcast %cst : f32 to vector<2x1024xf32>
    %2 = arith.minimumf %0, %1 : vector<2x1024xf32>
    %3 = math.exp %2 : vector<2x1024xf32>
    %c0_1 = arith.constant 0 : index
    %c0_2 = arith.constant 0 : index
    %4 = vector.load %arg2[%c0_1, %c0_2] : memref<2x1024xf32, #tpu.memory_space<vmem>>, vector<2x1024xf32>
    tpu.vector_store %arg2[%c0_1, %c0_2], %3 {strides = array<i32>} : memref<2x1024xf32, #tpu.memory_space<vmem>>, vector<2x1024xf32>,
    return
  }
  func.func @transform_0(%arg0: i32) -> (i32, i32) {
    %c0_i32 = arith.constant 0 : i32
    %c0_i32_0 = arith.constant 0 : i32
    return %arg0, %c0_i32 : i32, i32
  }
  func.func @transform_1(%arg0: i32) -> (i32, i32) {
    %c0_i32 = arith.constant 0 : i32
    %c0_i32_0 = arith.constant 0 : i32
    return %arg0, %c0_i32 : i32, i32
  }
}

</mosaic_0001>

<bundles_post_ra>
// kernel: tpu_custom_call.1
= control target key start
LH: loop header
LB: loop body
LE: loop exit
PB: predicated region body
PF: predicated region fallthrough
CT: control target
= control target key end

     0   :  { %6 = vsyncpa [#allocation3], 0  ;;  %s136_s0 = inlined_call_operand.hbm [shape: f32[2,1024], index: 0, kind: input, shape index: {}]   ;;  %s137_s1 = inlined_call_operand.hbm [shape: f32[2,1024], index: 1, kind: output, shape index: {}]  }
   0x1   :  { %7 = vsyncpa [#allocation4], 0  ;;  %s100_s6 = smov [#allocation2]   ;;  %s52_s10 = scalar_lea.hbm %s136_s0, 256 }
   0x2   :  { %s14_s7 = sshll.u32 %s100_s6, 4  ;;  %p53_p0 = scmp.ne.s32.totalorder %s136_s0, %s52_s10  ;;  %s15_s7 = int_to_ptr.vmem [resolvable:$true] %s14_s7 }
   0x3   :  { %p56_p1 = scmp.lt.u32.totalorder %s52_s10, %s136_s0 }
   0x5   :  { %p58_p2 = pnand %p56_p1, %p53_p0 }
   0x7   :  { %61 = shalt.err (!%p58_p2)
}
   0x8   :  { %s62_s15 = scalar_lea.vmem %s15_s7, 256  ;;  %p67_p4 = scmp.lt.s32.totalorder %s15_s7, %s15_s7 }
   0x9   :  { %p63_p3 = scmp.ne.s32.totalorder %s15_s7, %s62_s15  ;;  %p68_p5 = scmp.lt.s32.totalorder %s62_s15, %s62_s15 }
   0xb   :  { %p69_p6 = por %p68_p5, %p67_p4 }
   0xd   :  { %p70_p7 = pnand %p69_p6, %p63_p3 }
   0xf   :  { %73 = shalt.err (!%p70_p7)
}
  0x10   :  { %17 = dma.hbm_to_vmem [thread:$0]  %s136_s0, 256, %s15_s7, [#allocation3]  }
  0x11   :  { %96 = dma.done.wait [#allocation3], 256  }
  0x12   :  { %97 = vsyncadd [#allocation3], 4294967040  ;;  %v21_v0 = vld [vmem:[#allocation2] sm:$0xff]  ;;  %v22_v1 = vld [vmem:[#allocation2 + $0x8] sm:$0xff]  ;;  %s101_s18 = smov [#allocation5]  }
  0x13   :  { %v23_v2 = vmin.f32 %v21_v0, 5.0  ;;  %v24_v3 = vmin.f32 %v22_v1, 5.0  ;;  %s37_s19 = sshll.u32 %s101_s18, 4  ;;  %s38_s19 = int_to_ptr.vmem [resolvable:$true] %s37_s19 }
  0x14   :  { %s74_s20 = scalar_lea.vmem %s38_s19, 256  ;;  %p79_p9 = scmp.lt.s32.totalorder %s38_s19, %s38_s19 }
  0x15   :  { %v25_v4 = vmul.f32 1.442695, %v23_v2  ;;  %v27_v5 = vmul.f32 1.442695, %v24_v3  ;;  %p75_p8 = scmp.ne.s32.totalorder %s38_s19, %s74_s20  ;;  %p80_p10 = scmp.lt.s32.totalorder %s74_s20, %s74_s20 }
  0x17   :  { %48 = vpow2.f32 %v25_v4  ;;  %p81_p11 = por %p80_p10, %p79_p9 }
  0x18   :  { %50 = vpow2.f32 %v27_v5 }
  0x19   :  { %p82_p12 = pnand %p81_p11, %p75_p8 }
  0x21   :  { %v49_v6 = vpop.eup %48 }
  0x22   :  { %v51_v7 = vpop.eup %50  ;;  %29 = vst [vmem:[#allocation5] sm:$0xff] %v49_v6 }
  0x23   :  { %30 = vst [vmem:[#allocation5 + $0x8] sm:$0xff] %v51_v7 }
  0x24   :  { %85 = shalt.err (!%p82_p12)
}
  0x25   :  { %s86_s22 = scalar_lea.hbm %s137_s1, 256 }
  0x26   :  { %p87_p13 = scmp.ne.s32.totalorder %s137_s1, %s86_s22  ;;  %p90_p0 = scmp.lt.u32.totalorder %s86_s22, %s137_s1 }
  0x28   :  { %p92_p1 = pnand %p90_p0, %p87_p13 }
  0x2a   :  { %95 = shalt.err (!%p92_p1)
}
  0x2b   :  { %40 = dma.vmem_to_hbm [thread:$0]  %s38_s19, 256, %s137_s1, [#allocation4]  }
  0x2c   :  { %98 = dma.done.wait [#allocation4], 256  }
  0x2d   :  { %99 = vsyncadd [#allocation4], 4294967040 }
  0x2e   :  { %44 = vsyncpa [#allocation3], 1 }
  0x2f   :  { %45 = vsyncpa [#allocation4], 1 }

</bundles_post_ra>
